<compile_context>
chip_gen: v5e
topology: v5e:2x2
jax: 0.10.0
libtpu: 0.0.40
codegen_flags: <defaults>
</compile_context>

<pallas_src>
import jax
import jax.numpy as jnp
from jax.experimental import pallas as pl
from jax.experimental.pallas import tpu as pltpu

TILE_B = 2048   # batch rows per grid step (DMA-dominated step on v5e/v6e/v7x)


def _mlp_kernel(x_ref, w1_ref, b1_ref, w2_ref, b2_ref, w3_ref, b3_ref, o_ref):
    # One (tile_b, in) tile of x -> one (tile_b, 249) tile of output.
    # Three small matmuls (MXU) + ReLU (VPU) + tanh-form sigmoid (EUP) fused.
    hp = jax.lax.Precision.HIGHEST
    x = x_ref[...].astype(jnp.float32)

    h1 = jnp.dot(x, w1_ref[...], preferred_element_type=jnp.float32,
                 precision=hp) + b1_ref[...]
    h1 = jnp.maximum(h1, 0.0)                          # relu

    h2 = jnp.dot(h1, w2_ref[...], preferred_element_type=jnp.float32,
                 precision=hp) + b2_ref[...]
    h2 = jnp.maximum(h2, 0.0)                          # relu

    logits = jnp.dot(h2, w3_ref[...], preferred_element_type=jnp.float32,
                     precision=hp) + b3_ref[...]
    # sigmoid(x) == 0.5 * tanh(0.5 * x) + 0.5  (exact; EUP tanh + VPU FMA,
    # avoids the multi-step f32 reciprocal on the VALU)
    o_ref[...] = (0.5 * jnp.tanh(0.5 * logits) + 0.5).astype(o_ref.dtype)


def fitness_rec_forward(x, params, tile_b=TILE_B, out_dtype=jnp.float32):
    """Forward pass matching FitnessRecModel.forward.

    x: (batch, input_size), any float dtype (cast to f32 inside the kernel).
    params: dict with w1 (in,64), b1 (1,64), w2 (64,32), b2 (1,32),
            w3 (32,249), b3 (1,249), all float32.
    Returns: (batch, 249) in (0, 1), dtype = out_dtype (default float32 to
             match the PyTorch module).
    """
    batch, in_dim = x.shape
    out_dim = params["w3"].shape[1]  # 249

    # Cap the tile for small batches (keep the sublane dim a multiple of 8).
    # No batch padding: Pallas handles the ragged last block (masked writeback).
    tile_b = int(min(tile_b, max(8, -(-batch // 8) * 8)))
    grid = (pl.cdiv(batch, tile_b),)

    # Weights/biases: full-array blocks with constant index_map -> resident in
    # VMEM across all grid steps (fetched once, no re-DMA per tile).
    resident = lambda a: pl.BlockSpec(a.shape, lambda i: (0,) * a.ndim)

    out_bytes = jnp.dtype(out_dtype).itemsize
    cost = pl.CostEstimate(
        flops=2 * batch * (in_dim * 64 + 64 * 32 + 32 * out_dim),
        transcendentals=batch * out_dim,               # tanh (sigmoid)
        bytes_accessed=(
            batch * in_dim * x.dtype.itemsize
            + batch * out_dim * out_bytes
            + sum(int(p.size) * 4 for p in params.values())
        ),
    )

    return pl.pallas_call(
        _mlp_kernel,
        out_shape=jax.ShapeDtypeStruct((batch, out_dim), out_dtype),
        grid=grid,
        in_specs=[
            pl.BlockSpec((tile_b, in_dim), lambda i: (i, 0)),   # streamed x
            resident(params["w1"]), resident(params["b1"]),
            resident(params["w2"]), resident(params["b2"]),
            resident(params["w3"]), resident(params["b3"]),
        ],
        # Last block dim 249 == full array dim -> legal; store is the logical
        # width so no post-kernel slice copy is needed.
        out_specs=pl.BlockSpec((tile_b, out_dim), lambda i: (i, 0)),
        compiler_params=pltpu.CompilerParams(
            dimension_semantics=("parallel",),   # megacore sharding on v7x
        ),
        cost_estimate=cost,
    )(x, params["w1"], params["b1"], params["w2"], params["b2"],
      params["w3"], params["b3"])


def init_params(key, input_size):
    """Deterministic parameter init (PyTorch-style uniform fan_in bounds)."""
    dims = [(input_size, 64), (64, 32), (32, 249)]
    params = {}
    for i, (fan_in, fan_out) in enumerate(dims, start=1):
        key, kw, kb = jax.random.split(key, 3)
        bound = 1.0 / jnp.sqrt(jnp.float32(fan_in))
        params[f"w{i}"] = jax.random.uniform(
            kw, (fan_in, fan_out), jnp.float32, -bound, bound)
        params[f"b{i}"] = jax.random.uniform(
            kb, (1, fan_out), jnp.float32, -bound, bound)
    return params


def reference_forward(x, params):
    """Pure-JAX reference for correctness check (HIGHEST-precision f32)."""
    hp = jax.lax.Precision.HIGHEST
    h = jnp.maximum(
        jnp.dot(x.astype(jnp.float32), params["w1"], precision=hp) + params["b1"], 0.0)
    h = jnp.maximum(jnp.dot(h, params["w2"], precision=hp) + params["b2"], 0.0)
    return jax.nn.sigmoid(jnp.dot(h, params["w3"], precision=hp) + params["b3"])


if __name__ == "__main__":
    key = jax.random.PRNGKey(0)
    k_x, k_p = jax.random.split(key)

    batch, input_size = 8, 16
    x = jax.random.normal(k_x, (batch, input_size), jnp.float32)
    params = init_params(k_p, input_size)

    out = jax.block_until_ready(fitness_rec_forward(x, params))
    ref = reference_forward(x, params)
    assert out.shape == (batch, 249), out.shape
    assert jnp.allclose(out, ref, atol=1e-5, rtol=1e-5), "mismatch vs reference"

    # Exercise the multi-tile + ragged-tail path (grid of 5, last block only
    # 6 valid rows) to verify the masked writeback handling.
    k_x2 = jax.random.fold_in(k_x, 1)
    x_big = jax.random.normal(k_x2, (1030, input_size), jnp.float32)
    out_big = jax.block_until_ready(fitness_rec_forward(x_big, params, tile_b=256))
    ref_big = reference_forward(x_big, params)
    assert out_big.shape == (1030, 249), out_big.shape
    assert jnp.allclose(out_big, ref_big, atol=1e-5, rtol=1e-5), "mismatch (big)"

    print("KERNEL_OK")
</pallas_src>

<mosaic_0001>
module attributes {stable_mosaic.version = 11 : i64} {
  func.func @_mlp_kernel(%arg0: i32, %arg1: memref<8x16xf32, #tpu.memory_space<vmem>>, %arg2: memref<16x64xf32, #tpu.memory_space<vmem>>, %arg3: memref<1x64xf32, #tpu.memory_space<vmem>>, %arg4: memref<64x32xf32, #tpu.memory_space<vmem>>, %arg5: memref<1x32xf32, #tpu.memory_space<vmem>>, %arg6: memref<32x249xf32, #tpu.memory_space<vmem>>, %arg7: memref<1x249xf32, #tpu.memory_space<vmem>>, %arg8: memref<8x249xf32, #tpu.memory_space<vmem>>) attributes {dimension_semantics = [#tpu.dimension_semantics<parallel>], iteration_bounds = array<i64: 1>, scalar_prefetch = 0 : i64, scratch_operands = 0 : i64, tpu.core_type = #tpu.core_type<tc>, window_params = [{transform_indices = @transform_0, window_bounds = array<i64: 8, 16>}, {pipeline_mode = #tpu.pipeline_mode<synchronous>, transform_indices = @transform_1, window_bounds = array<i64: 16, 64>}, {pipeline_mode = #tpu.pipeline_mode<synchronous>, transform_indices = @transform_2, window_bounds = array<i64: 1, 64>}, {pipeline_mode = #tpu.pipeline_mode<synchronous>, transform_indices = @transform_3, window_bounds = array<i64: 64, 32>}, {pipeline_mode = #tpu.pipeline_mode<synchronous>, transform_indices = @transform_4, window_bounds = array<i64: 1, 32>}, {pipeline_mode = #tpu.pipeline_mode<synchronous>, transform_indices = @transform_5, window_bounds = array<i64: 32, 249>}, {pipeline_mode = #tpu.pipeline_mode<synchronous>, transform_indices = @transform_6, window_bounds = array<i64: 1, 249>}, {transform_indices = @transform_7, window_bounds = array<i64: 8, 249>}]} {
    %c0 = arith.constant 0 : index
    %c0_0 = arith.constant 0 : index
    %0 = vector.load %arg1[%c0, %c0_0] : memref<8x16xf32, #tpu.memory_space<vmem>>, vector<8x16xf32>
    %c0_1 = arith.constant 0 : index
    %c0_2 = arith.constant 0 : index
    %1 = vector.load %arg2[%c0_1, %c0_2] : memref<16x64xf32, #tpu.memory_space<vmem>>, vector<16x64xf32>
    %cst = arith.constant dense<0.000000e+00> : vector<8x64xf32>
    %2 = tpu.matmul %0, %1, %cst {dimension_numbers = #tpu.dot_dimension_numbers<[1], [0], [0], [1], [0, 0, 1, 1], [], []>, precision = #tpu.contract_precision<fp32>} : vector<8x16xf32>, vector<16x64xf32>, vector<8x64xf32> -> vector<8x64xf32>
    %c0_3 = arith.constant 0 : index
    %c0_4 = arith.constant 0 : index
    %3 = vector.load %arg3[%c0_3, %c0_4] : memref<1x64xf32, #tpu.memory_space<vmem>>, vector<1x64xf32>
    %4 = vector.broadcast %3 : vector<1x64xf32> to vector<8x64xf32>
    %5 = arith.addf %2, %4 : vector<8x64xf32>
    %cst_5 = arith.constant 0.000000e+00 : f32
    %6 = vector.broadcast %cst_5 : f32 to vector<8x64xf32>
    %7 = arith.maximumf %5, %6 : vector<8x64xf32>
    %c0_6 = arith.constant 0 : index
    %c0_7 = arith.constant 0 : index
    %8 = vector.load %arg4[%c0_6, %c0_7] : memref<64x32xf32, #tpu.memory_space<vmem>>, vector<64x32xf32>
    %cst_8 = arith.constant dense<0.000000e+00> : vector<8x32xf32>
    %9 = tpu.matmul %7, %8, %cst_8 {dimension_numbers = #tpu.dot_dimension_numbers<[1], [0], [0], [1], [0, 0, 1, 1], [], []>, precision = #tpu.contract_precision<fp32>} : vector<8x64xf32>, vector<64x32xf32>, vector<8x32xf32> -> vector<8x32xf32>
    %c0_9 = arith.constant 0 : index
    %c0_10 = arith.constant 0 : index
    %10 = vector.load %arg5[%c0_9, %c0_10] : memref<1x32xf32, #tpu.memory_space<vmem>>, vector<1x32xf32>
    %11 = vector.broadcast %10 : vector<1x32xf32> to vector<8x32xf32>
    %12 = arith.addf %9, %11 : vector<8x32xf32>
    %cst_11 = arith.constant 0.000000e+00 : f32
    %13 = vector.broadcast %cst_11 : f32 to vector<8x32xf32>
    %14 = arith.maximumf %12, %13 : vector<8x32xf32>
    %c0_12 = arith.constant 0 : index
    %c0_13 = arith.constant 0 : index
    %15 = vector.load %arg6[%c0_12, %c0_13] : memref<32x249xf32, #tpu.memory_space<vmem>>, vector<32x249xf32>
    %cst_14 = arith.constant dense<0.000000e+00> : vector<8x249xf32>
    %16 = tpu.matmul %14, %15, %cst_14 {dimension_numbers = #tpu.dot_dimension_numbers<[1], [0], [0], [1], [0, 0, 1, 1], [], []>, precision = #tpu.contract_precision<fp32>} : vector<8x32xf32>, vector<32x249xf32>, vector<8x249xf32> -> vector<8x249xf32>
    %c0_15 = arith.constant 0 : index
    %c0_16 = arith.constant 0 : index
    %17 = vector.load %arg7[%c0_15, %c0_16] : memref<1x249xf32, #tpu.memory_space<vmem>>, vector<1x249xf32>
    %18 = vector.broadcast %17 : vector<1x249xf32> to vector<8x249xf32>
    %19 = arith.addf %16, %18 : vector<8x249xf32>
    %cst_17 = arith.constant 5.000000e-01 : f32
    %20 = vector.broadcast %cst_17 : f32 to vector<8x249xf32>
    %21 = arith.mulf %20, %19 : vector<8x249xf32>
    %22 = math.tanh %21 : vector<8x249xf32>
    %cst_18 = arith.constant 5.000000e-01 : f32
    %23 = vector.broadcast %cst_18 : f32 to vector<8x249xf32>
    %24 = arith.mulf %23, %22 : vector<8x249xf32>
    %cst_19 = arith.constant 5.000000e-01 : f32
    %25 = vector.broadcast %cst_19 : f32 to vector<8x249xf32>
    %26 = arith.addf %24, %25 : vector<8x249xf32>
    %c0_20 = arith.constant 0 : index
    %c0_21 = arith.constant 0 : index
    %27 = vector.load %arg8[%c0_20, %c0_21] : memref<8x249xf32, #tpu.memory_space<vmem>>, vector<8x249xf32>
    tpu.vector_store %arg8[%c0_20, %c0_21], %26 {strides = array<i32>} : memref<8x249xf32, #tpu.memory_space<vmem>>, vector<8x249xf32>,
    return
  }
  func.func @transform_0(%arg0: i32) -> (i32, i32) {
    %c0_i32 = arith.constant 0 : i32
    %c0_i32_0 = arith.constant 0 : i32
    return %arg0, %c0_i32 : i32, i32
  }
  func.func @transform_1(%arg0: i32) -> (i32, i32) {
    %c0_i32 = arith.constant 0 : i32
    %c0_i32_0 = arith.constant 0 : i32
    %c0_i32_1 = arith.constant 0 : i32
    return %c0_i32, %c0_i32_0 : i32, i32
  }
  func.func @transform_2(%arg0: i32) -> (i32, i32) {
    %c0_i32 = arith.constant 0 : i32
    %c0_i32_0 = arith.constant 0 : i32
    %c0_i32_1 = arith.constant 0 : i32
    return %c0_i32, %c0_i32_0 : i32, i32
  }
  func.func @transform_3(%arg0: i32) -> (i32, i32) {
    %c0_i32 = arith.constant 0 : i32
    %c0_i32_0 = arith.constant 0 : i32
    %c0_i32_1 = arith.constant 0 : i32
    return %c0_i32, %c0_i32_0 : i32, i32
  }
  func.func @transform_4(%arg0: i32) -> (i32, i32) {
    %c0_i32 = arith.constant 0 : i32
    %c0_i32_0 = arith.constant 0 : i32
    %c0_i32_1 = arith.constant 0 : i32
    return %c0_i32, %c0_i32_0 : i32, i32
  }
  func.func @transform_5(%arg0: i32) -> (i32, i32) {
    %c0_i32 = arith.constant 0 : i32
    %c0_i32_0 = arith.constant 0 : i32
    %c0_i32_1 = arith.constant 0 : i32
    return %c0_i32, %c0_i32_0 : i32, i32
  }
  func.func @transform_6(%arg0: i32) -> (i32, i32) {
    %c0_i32 = arith.constant 0 : i32
    %c0_i32_0 = arith.constant 0 : i32
    %c0_i32_1 = arith.constant 0 : i32
    return %c0_i32, %c0_i32_0 : i32, i32
  }
  func.func @transform_7(%arg0: i32) -> (i32, i32) {
    %c0_i32 = arith.constant 0 : i32
    %c0_i32_0 = arith.constant 0 : i32
    return %arg0, %c0_i32 : i32, i32
  }
}

</mosaic_0001>

<bundles_post_ra>
// kernel: tpu_custom_call.1
= control target key start
LH: loop header
LB: loop body
LE: loop exit
PB: predicated region body
PF: predicated region fallthrough
CT: control target
= control target key end

     0   :  { %vm34_vm0 = vcmask 130048   ;;  %s1090_s0 = inlined_call_operand.vmem [shape: f32[8,16], index: 0, kind: input, shape index: {}]   ;;  %s1091_s1 = inlined_call_operand.vmem [shape: f32[16,64], index: 1, kind: input, shape index: {}]   ;;  %s1092_s2 = inlined_call_operand.vmem [shape: f32[1,64], index: 2, kind: input, shape index: {}]   ;;  %s1093_s3 = inlined_call_operand.vmem [shape: f32[64,32], index: 3, kind: input, shape index: {}]   ;;  %s1094_s4 = inlined_call_operand.vmem [shape: f32[1,32], index: 4, kind: input, shape index: {}]   ;;  %s1095_s5 = inlined_call_operand.vmem [shape: f32[32,249], index: 5, kind: input, shape index: {}]   ;;  %s1096_s6 = inlined_call_operand.vmem [shape: f32[1,249], index: 6, kind: input, shape index: {}]   ;;  %s1097_s7 = inlined_call_operand.hbm [shape: f32[8,249], index: 7, kind: output, shape index: {}]  }
   0x1   :  { %v29_v0 = vld [vmem:[%s1091_s1 + $0x8] sm:$0xff]  ;;  %v28_v1 = vld [vmem:[%s1091_s1] sm:$0xff]  ;;  %v205_v6 = vld [vmem:[%s1093_s3 + $0x38] sm:$0xff] }
   0x2   :  { %v27_v2 = vld [vmem:[%s1090_s0] sm:$0xff]  ;;  %v52_v3 = vand.u32 4294901760, %v29_v0  ;;  %v54_v4 = vand.u32 4294901760, %v28_v1  ;;  %v204_v7 = vld [vmem:[%s1093_s3 + $0x30] sm:$0xff]  ;;  %v956_v9 = vand.u32 4294901760, %v205_v6 }
   0x3   :  { %v36_v5 = vsel %vm34_vm0, %v27_v2, 0  ;;  %v958_v10 = vand.u32 4294901760, %v204_v7 }
   0x4   :  { %v56_v8 = vand.u32 4294901760, %v36_v5  ;;  %v80_v11 = vsub.f32 %v29_v0, %v52_v3  ;;  %53 = vmatpush.msra.mxu0 %v52_v3  ;;  %v86_v12 = vsub.f32 %v28_v1, %v54_v4  ;;  %137 = vmatpush.msra.mxu3 %v52_v3 }
   0x5   :  { %12 = vsyncpa [#allocation3], 0  ;;  %v961_v14 = vsub.f32 %v205_v6, %v956_v9  ;;  %v964_v15 = vsub.f32 %v204_v7, %v958_v10  ;;  %v203_v31 = vld [vmem:[%s1093_s3 + $0x28] sm:$0xff]  ;;  %v202_v33 = vld [vmem:[%s1093_s3 + $0x20] sm:$0xff]  ;;  %vm210_vm1 = vcmask 523264   ;;  %vm466_vm2 = vcmask 261120  }
   0x6   :  { %v57_v13 = vsub.f32 %v36_v5, %v56_v8  ;;  %112 = vmatpush.msra.mxu2 %v80_v11  ;;  %55 = vmatpush.msra.mxu0 %v54_v4  ;;  %v81_v16 = vand.u32 4294901760, %v80_v11  ;;  %v87_v17 = vand.u32 4294901760, %v86_v12  ;;  %v983_v32 = vand.u32 4294901760, %v203_v31  ;;  %v201_v36 = vld [vmem:[%s1093_s3 + $0x18] sm:$0xff]  ;;  %v200_v40 = vld [vmem:[%s1093_s3 + $0x10] sm:$0xff]  ;;  %v199_v45 = vld [vmem:[%s1093_s3 + $0x8] sm:$0xff] }
   0x7   :  { %139 = vmatpush.msra.mxu3 %v54_v4  ;;  %v257_v19 = vand.u32 4294901760, %v961_v14  ;;  %v263_v20 = vand.u32 4294901760, %v964_v15  ;;  %v989_v35 = vand.u32 4294901760, %v202_v33  ;;  %v230_v39 = vand.u32 4294901760, %v201_v36  ;;  %v198_v51 = vld [vmem:[%s1093_s3] sm:$0xff]  ;;  %s858_s17 = sshll.u32 %s1097_s7, 4  ;;  %s859_s17 = int_to_ptr.hbm [resolvable:$true] %s858_s17 }
   0x8   :  { %v58_v18 = vand.u32 4294901760, %v57_v13  ;;  %115 = vmatpush.msra.mxu2 %v86_v12  ;;  %v82_v21 = vsub.f32 %v80_v11, %v81_v16  ;;  %164 = vmatpush.msrb.mxu0 %v81_v16  ;;  %v88_v22 = vsub.f32 %v86_v12, %v87_v17  ;;  %v268_v34 = vsub.f32 %v203_v31, %v983_v32 }
   0x9   :  { %118 = vmatmul.f32.vlgmr.msra.gmra.mxu2 %v57_v13  ;;  %v258_v24 = vsub.f32 %v961_v14, %v257_v19  ;;  %v264_v25 = vsub.f32 %v964_v15, %v263_v20  ;;  %v274_v38 = vsub.f32 %v202_v33, %v989_v35  ;;  %v280_v43 = vsub.f32 %v201_v36, %v230_v39 }
   0xa   :  { %v59_v23 = vsub.f32 %v57_v13, %v58_v18  ;;  %143 = vmatmul.f32.vlgmr.msra.gmra.mxu3 %v58_v18  ;;  %v83_v26 = vand.u32 4294901760, %v82_v21  ;;  %v89_v27 = vand.u32 4294901760, %v88_v22  ;;  %168 = vmatpush.msrb.mxu0 %v87_v17  ;;  %v269_v37 = vand.u32 4294901760, %v268_v34 }
   0xb   :  { %223 = vmatpush.msrb.mxu2 %v956_v9  ;;  %v259_v29 = vand.u32 4294901760, %v258_v24  ;;  %v265_v30 = vand.u32 4294901760, %v264_v25  ;;  %v275_v42 = vand.u32 4294901760, %v274_v38  ;;  %v232_v44 = vand.u32 4294901760, %v200_v40  ;;  %v456_v25 = vld [vmem:[%s1095_s5 + $0x20] sm:$0xff] }
   0xc   :  { %v60_v28 = vand.u32 4294901760, %v59_v23  ;;  %84 = vmatpush.msra.mxu1 %v83_v26  ;;  %v270_v41 = vsub.f32 %v268_v34, %v269_v37  ;;  %v281_v48 = vand.u32 4294901760, %v280_v43  ;;  %v234_v50 = vand.u32 4294901760, %v199_v45  ;;  %v458_v23 = vld [vmem:[%s1095_s5 + $0x30] sm:$0xff] }
   0xd   :  { %225 = vmatpush.msrb.mxu2 %v958_v10  ;;  %260 = vmatpush.msrb.mxu3 %v259_v29  ;;  %v276_v47 = vsub.f32 %v274_v38, %v275_v42  ;;  %v286_v49 = vsub.f32 %v200_v40, %v232_v44  ;;  %v236_v55 = vand.u32 4294901760, %v198_v51  ;;  %v482_v24 = vand.u32 4294901760, %v458_v23 }
   0xe   :  { %61 = vmatmul.f32.vlgmr.msra.gmra.mxu0 %v60_v28  ;;  %90 = vmatpush.msra.mxu1 %v89_v27  ;;  %v271_v46 = vand.u32 4294901760, %v270_v41  ;;  %v282_v53 = vsub.f32 %v280_v43, %v281_v48  ;;  %v292_v56 = vsub.f32 %v199_v45, %v234_v50  ;;  %v484_v27 = vand.u32 4294901760, %v456_v25  ;;  %v454_v28 = vld [vmem:[%s1095_s5 + $0x10] sm:$0xff] }
   0xf   :  { %318 = vmatpush.msra.mxu0 %v961_v14  ;;  %92 = vmatmul.f32.vlgmr.msra.gmra.mxu1 %v56_v8  ;;  %v277_v52 = vand.u32 4294901760, %v276_v47  ;;  %v287_v54 = vand.u32 4294901760, %v286_v49  ;;  %v298_v59 = vsub.f32 %v198_v51, %v236_v55  ;;  %v512_v26 = vsub.f32 %v458_v23, %v482_v24  ;;  %v459_v47 = vld [vmem:[%s1095_s5 + $0x38] sm:$0xff] }
  0x10   :  { %266 = vmatpush.msrb.mxu3 %v265_v30  ;;  %189 = vmatpush.msrb.mxu1 %v52_v3  ;;  %v283_v57 = vand.u32 4294901760, %v282_v53  ;;  %v293_v60 = vand.u32 4294901760, %v292_v56  ;;  %v868_v3 = vld [vmem:[%s1092_s2] ss:$0 sm:$0xff]  ;;  %v518_v30 = vsub.f32 %v456_v25, %v484_v27  ;;  %v486_v31 = vand.u32 4294901760, %v454_v28  ;;  %v453_v53 = vld [vmem:[%s1095_s5 + $0x8] sm:$0xff] }
  0x11   :  { %321 = vmatpush.msra.mxu0 %v964_v15  ;;  %227 = vmatpush.msrb.mxu2 %v983_v32  ;;  %v288_v58 = vsub.f32 %v286_v49, %v287_v54  ;;  %v299_v62 = vand.u32 4294901760, %v298_v59  ;;  %v513_v29 = vand.u32 4294901760, %v512_v26  ;;  %vm849_vm3 = vcmask 990208  }
  0x12   :  { %191 = vmatpush.msrb.mxu1 %v54_v4  ;;  %272 = vmatpush.msrb.mxu3 %v271_v46  ;;  %v294_v63 = vsub.f32 %v292_v56, %v293_v60 }
  0x13   :  { %324 = vmatpush.msra.mxu0 %v268_v34  ;;  %229 = vmatpush.msrb.mxu2 %v989_v35  ;;  %v289_v61 = vand.u32 4294901760, %v288_v58  ;;  %v300_v0 = vsub.f32 %v298_v59, %v299_v62  ;;  %v514_v33 = vsub.f32 %v512_v26, %v513_v29  ;;  %v519_v34 = vand.u32 4294901760, %v518_v30 }
  0x14   :  { %355 = vmatpush.msra.mxu1 %v956_v9  ;;  %278 = vmatpush.msrb.mxu3 %v277_v52  ;;  %v295_v1 = vand.u32 4294901760, %v294_v63  ;;  %v455_v52 = vld [vmem:[%s1095_s5 + $0x18] sm:$0xff] }
  0x15   :  { %327 = vmatpush.msra.mxu0 %v274_v38  ;;  %231 = vmatpush.msrb.mxu2 %v230_v39  ;;  %v301_v2 = vand.u32 4294901760, %v300_v0  ;;  %v520_v38 = vsub.f32 %v518_v30, %v519_v34 }
  0x16   :  { %170 = vmatmul.f32.vlgmr.msrb.gmra.mxu0 %v56_v8  ;;  %357 = vmatpush.msra.mxu1 %v958_v10 }
  0x17   :  { %193 = vmatmul.f32.vlgmr.msrb.gmra.mxu1 %v56_v8  ;;  %330 = vmatpush.msra.mxu0 %v280_v43  ;;  %v521_v41 = vand.u32 4294901760, %v520_v38 }
  0x18   :  { %359 = vmatpush.msra.mxu1 %v983_v32  ;;  %233 = vmatpush.msrb.mxu2 %v232_v44 }
  0x19   :  { %333 = vmatpush.msra.mxu0 %v286_v49  ;;  %284 = vmatpush.msrb.mxu3 %v283_v57  ;;  %v457_v49 = vld [vmem:[%s1095_s5 + $0x28] sm:$0xff] }
  0x1a   :  { %361 = vmatpush.msra.mxu1 %v989_v35  ;;  %235 = vmatpush.msrb.mxu2 %v234_v50  ;;  %v1043_v51 = vand.u32 4294901760, %v457_v49 }
  0x1b   :  { %336 = vmatpush.msra.mxu0 %v292_v56  ;;  %290 = vmatpush.msrb.mxu3 %v289_v61  ;;  %v1055_v56 = vand.u32 4294901760, %v453_v53 }
  0x1c   :  { %363 = vmatpush.msra.mxu1 %v230_v39  ;;  %237 = vmatpush.msrb.mxu2 %v236_v55 }
  0x1d   :  { %339 = vmatpush.msra.mxu0 %v298_v59  ;;  %296 = vmatpush.msrb.mxu3 %v295_v1  ;;  %v1062_v58 = vsub.f32 %v453_v53, %v1055_v56  ;;  %v869_v59 = vld [vmem:[%s1094_s4] ss:$0 sm:$0xff] }
  0x1e   :  { %365 = vmatpush.msra.mxu1 %v232_v44  ;;  %388 = vmatpush.msra.mxu2 %v257_v19 }
  0x1f   :  { %302 = vmatpush.msrb.mxu3 %v301_v2  ;;  %483 = vmatpush.msrb.mxu0 %v482_v24 }
  0x20   :  { %367 = vmatpush.msra.mxu1 %v234_v50  ;;  %392 = vmatpush.msra.mxu2 %v263_v20 }
  0x21   :  { %431 = vmatpush.msra.mxu3 %v956_v9  ;;  %485 = vmatpush.msrb.mxu0 %v484_v27 }
  0x22   :  { %369 = vmatpush.msra.mxu1 %v236_v55  ;;  %396 = vmatpush.msra.mxu2 %v269_v37  ;;  %v515_v37 = vand.u32 4294901760, %v514_v33 }
  0x23   :  { %433 = vmatpush.msra.mxu3 %v958_v10  ;;  %487 = vmatpush.msrb.mxu0 %v486_v31 }
  0x24   :  { %400 = vmatpush.msra.mxu2 %v275_v42  ;;  %516 = vmatpush.msrb.mxu1 %v515_v37 }
  0x25   :  { %435 = vmatpush.msra.mxu3 %v983_v32  ;;  %v452_v32 = vld [vmem:[%s1095_s5] sm:$0xff] }
  0x26   :  { %404 = vmatpush.msra.mxu2 %v281_v48  ;;  %v488_v36 = vand.u32 4294901760, %v452_v32  ;;  %522 = vmatpush.msrb.mxu1 %v521_v41  ;;  %v1034_v48 = vand.u32 4294901760, %v459_v47 }
  0x27   :  { %437 = vmatpush.msra.mxu3 %v989_v35  ;;  %v524_v35 = vsub.f32 %v454_v28, %v486_v31  ;;  %v460_v28 = vld [vmem:[%s1096_s6] sm:$0x3]  ;;  %s900_s6 = smov [#allocation2]  }
  0x28   :  { %408 = vmatpush.msra.mxu2 %v287_v54  ;;  %v530_v40 = vsub.f32 %v452_v32, %v488_v36  ;;  %489 = vmatpush.msrb.mxu0 %v488_v36  ;;  %v1053_v54 = vsub.f32 %v457_v49, %v1043_v51  ;;  %s856_s14 = sshll.u32 %s900_s6, 4  ;;  %s857_s14 = int_to_ptr.vmem [resolvable:$true] %s856_s14 }
  0x29   :  { %439 = vmatpush.msra.mxu3 %v230_v39  ;;  %v525_v39 = vand.u32 4294901760, %v524_v35 }
  0x2a   :  { %412 = vmatpush.msra.mxu2 %v293_v60  ;;  %v531_v43 = vand.u32 4294901760, %v530_v40 }
  0x2b   :  { %441 = vmatpush.msra.mxu3 %v232_v44  ;;  %v526_v42 = vsub.f32 %v524_v35, %v525_v39 }
  0x2c   :  { %416 = vmatpush.msra.mxu2 %v299_v62  ;;  %v532_v45 = vsub.f32 %v530_v40, %v531_v43 }
  0x2d   :  { %443 = vmatpush.msra.mxu3 %v234_v50  ;;  %v527_v44 = vand.u32 4294901760, %v526_v42  ;;  %v1040_v50 = vsub.f32 %v459_v47, %v1034_v48 }
  0x2e   :  { %v533_v46 = vand.u32 4294901760, %v532_v45 }
  0x2f   :  { %445 = vmatpush.msra.mxu3 %v236_v55  ;;  %528 = vmatpush.msrb.mxu1 %v527_v44  ;;  %v671_v55 = vand.u32 4294901760, %v455_v52 }
  0x31   :  { %534 = vmatpush.msrb.mxu1 %v533_v46  ;;  %v1059_v57 = vsub.f32 %v455_v52, %v671_v55 }
  0x8b   :  { %v62_v4 = vpop.f32.mrf.mxu0 }
  0x8c   :  { %v63_v5 = vadd.f32 %v868_v3, %v62_v4  ;;  %v93_v6 = vpop.f32.mrf.mxu1  ;;  %v119_v7 = vpop.f32.mrf.mxu2  ;;  %v698_v4 = vand.u32 4294901760, %v1040_v50 }
  0x8d   :  { %v144_v9 = vpop.f32.mrf.mxu3 }
  0x8e   :  { %v94_v8 = vadd.f32 %v93_v6, %v63_v5 }
  0x90   :  { %v120_v10 = vadd.f32 %v119_v7, %v94_v8  ;;  %v704_v7 = vand.u32 4294901760, %v1053_v54 }
  0x92   :  { %v145_v11 = vadd.f32 %v144_v9, %v120_v10  ;;  %v699_v10 = vsub.f32 %v1040_v50, %v698_v4 }
  0x93   :  { %v171_v12 = vpop.f32.mrf.mxu0 }
  0x94   :  { %v172_v13 = vadd.f32 %v171_v12, %v145_v11  ;;  %v194_v14 = vpop.f32.mrf.mxu1  ;;  %v710_v11 = vand.u32 4294901760, %v1059_v57 }
  0x96   :  { %v195_v15 = vadd.f32 %v194_v14, %v172_v13  ;;  %v705_v13 = vsub.f32 %v1053_v54, %v704_v7  ;;  %v716_v14 = vand.u32 4294901760, %v1062_v58 }
  0x98   :  { %v197_v16 = vmax.f32 %v195_v15, 0.0 }
  0x9a   :  { %v212_v17 = vsel %vm210_vm1, %v197_v16, 0  ;;  %v700_v16 = vand.u32 4294901760, %v699_v10 }
  0x9b   :  { %v238_v18 = vand.u32 4294901760, %v212_v17 }
  0x9d   :  { %v239_v19 = vsub.f32 %v212_v17, %v238_v18  ;;  %304 = vmatmul.f32.vlgmr.msrb.gmra.mxu3 %v238_v18  ;;  %v711_v17 = vsub.f32 %v1059_v57, %v710_v11 }
  0x9e   :  { %643 = vmatpush.msrb.mxu3 %v482_v24 }
  0x9f   :  { %342 = vmatmul.f32.vlgmr.msra.gmra.mxu0 %v239_v19  ;;  %v240_v20 = vand.u32 4294901760, %v239_v19 }
  0xa0   :  { %645 = vmatpush.msrb.mxu3 %v484_v27  ;;  %554 = vmatpush.msra.mxu0 %v512_v26 }
  0xa1   :  { %373 = vmatmul.f32.vlgmr.msra.gmra.mxu1 %v240_v20  ;;  %v241_v21 = vsub.f32 %v239_v19, %v240_v20  ;;  %v706_v19 = vand.u32 4294901760, %v705_v13  ;;  %v717_v20 = vsub.f32 %v1062_v58, %v716_v14 }
  0xa2   :  { %647 = vmatpush.msrb.mxu3 %v486_v31  ;;  %557 = vmatpush.msra.mxu0 %v518_v30 }
  0xa3   :  { %v242_v22 = vand.u32 4294901760, %v241_v21  ;;  %583 = vmatpush.msra.mxu1 %v482_v24  ;;  %v718_v24 = vand.u32 4294901760, %v717_v20 }
  0xa4   :  { %649 = vmatpush.msrb.mxu3 %v488_v36  ;;  %560 = vmatpush.msra.mxu0 %v524_v35 }
  0xa5   :  { %243 = vmatmul.f32.vlgmr.msrb.gmra.mxu2 %v242_v22  ;;  %447 = vmatmul.f32.vlgmr.msra.gmra.mxu3 %v238_v18  ;;  %v712_v22 = vand.u32 4294901760, %v711_v17 }
  0xa6   :  { %612 = vmatpush.msrb.mxu2 %v513_v29  ;;  %768 = vmatpush.msra.mxu3 %v1034_v48  ;;  %v462_v29 = vperm.slane %v460_v28, 0 }
  0xa7   :  { %563 = vmatpush.msra.mxu0 %v530_v40  ;;  %585 = vmatpush.msra.mxu1 %v484_v27  ;;  %v463_v40 = vperm.slane %v460_v28, 1 }
  0xa8   :  { %616 = vmatpush.msrb.mxu2 %v519_v34  ;;  %770 = vmatpush.msra.mxu3 %v1043_v51 }
  0xa9   :  { %587 = vmatpush.msra.mxu1 %v486_v31 }
  0xaa   :  { %620 = vmatpush.msrb.mxu2 %v525_v39  ;;  %772 = vmatpush.msra.mxu3 %v671_v55 }
  0xab   :  { %589 = vmatpush.msra.mxu1 %v488_v36 }
  0xac   :  { %624 = vmatpush.msrb.mxu2 %v531_v43  ;;  %774 = vmatpush.msra.mxu3 %v1055_v56 }
  0xad   :  { %418 = vmatmul.f32.vlgmr.msra.gmra.mxu2 %v238_v18 }
  0xae   :  { %739 = vmatpush.msra.mxu2 %v1040_v50 }
  0xb0   :  { %742 = vmatpush.msra.mxu2 %v1053_v54 }
  0xb2   :  { %745 = vmatpush.msra.mxu2 %v1059_v57 }
  0xb4   :  { %748 = vmatpush.msra.mxu2 %v1062_v58 }
 0x11c   :  { %v343_v0 = vpop.f32.mrf.mxu0 }
 0x11e   :  { %v374_v2 = vpop.f32.mrf.mxu1 }
 0x120   :  { %v305_v60 = vpop.f32.mrf.mxu3 }
 0x128   :  { %v244_v61 = vpop.f32.mrf.mxu2  ;;  %v448_v8 = vpop.f32.mrf.mxu3 }
 0x129   :  { %v245_v62 = vadd.f32 %v869_v59, %v244_v61 }
 0x12b   :  { %v306_v63 = vadd.f32 %v305_v60, %v245_v62 }
 0x12d   :  { %v344_v1 = vadd.f32 %v343_v0, %v306_v63 }
 0x12f   :  { %v375_v3 = vadd.f32 %v374_v2, %v344_v1 }
 0x130   :  { %v419_v5 = vpop.f32.mrf.mxu2 }
 0x131   :  { %v420_v6 = vadd.f32 %v419_v5, %v375_v3 }
 0x133   :  { %v449_v9 = vadd.f32 %v448_v8, %v420_v6 }
 0x135   :  { %v451_v12 = vmax.f32 %v449_v9, 0.0 }
 0x137   :  { %v468_v15 = vsel %vm466_vm2, %v451_v12, 0 }
 0x138   :  { %v490_v18 = vand.u32 4294901760, %v468_v15 }
 0x13a   :  { %v491_v21 = vsub.f32 %v468_v15, %v490_v18  ;;  %536 = vmatmul.f32.vlgmr.msrb.gmra.mxu1 %v490_v18  ;;  %626 = vmatmul.f32.vlgmr.msrb.gmra.mxu2 %v490_v18 }
 0x13b   :  { %651 = vmatmul.f32.vlgmr.msrb.gmra.mxu3 %v490_v18  ;;  %701 = vmatpush.msrb.mxu1 %v700_v16 }
 0x13c   :  { %v492_v23 = vand.u32 4294901760, %v491_v21 }
 0x13d   :  { %707 = vmatpush.msrb.mxu1 %v706_v19 }
 0x13e   :  { %v493_v25 = vsub.f32 %v491_v21, %v492_v23 }
 0x13f   :  { %713 = vmatpush.msrb.mxu1 %v712_v22 }
 0x140   :  { %v494_v26 = vand.u32 4294901760, %v493_v25 }
 0x141   :  { %719 = vmatpush.msrb.mxu1 %v718_v24 }
 0x142   :  { %495 = vmatmul.f32.vlgmr.msrb.gmra.mxu0 %v494_v26  ;;  %593 = vmatmul.f32.vlgmr.msra.gmra.mxu1 %v492_v23 }
 0x143   :  { %751 = vmatmul.f32.vlgmr.msra.gmra.mxu2 %v491_v21  ;;  %778 = vmatmul.f32.vlgmr.msra.gmra.mxu3 %v492_v23 }
 0x144   :  { %668 = vmatpush.msrb.mxu0 %v1034_v48  ;;  %828 = vmatpush.msra.mxu1 %v1034_v48 }
 0x146   :  { %670 = vmatpush.msrb.mxu0 %v1043_v51  ;;  %830 = vmatpush.msra.mxu1 %v1043_v51 }
 0x148   :  { %672 = vmatpush.msrb.mxu0 %v671_v55  ;;  %832 = vmatpush.msra.mxu1 %v671_v55 }
 0x14a   :  { %566 = vmatmul.f32.vlgmr.msra.gmra.mxu0 %v491_v21  ;;  %721 = vmatmul.f32.vlgmr.msrb.gmra.mxu1 %v490_v18 }
 0x14b   :  { %674 = vmatpush.msrb.mxu0 %v1055_v56  ;;  %834 = vmatpush.msra.mxu1 %v1055_v56 }
 0x14d   :  { %797 = vmatpush.msra.mxu0 %v698_v4 }
 0x14f   :  { %801 = vmatpush.msra.mxu0 %v704_v7 }
 0x151   :  { %805 = vmatpush.msra.mxu0 %v710_v11 }
 0x152   :  { %680 = vmatmul.f32.vlgmr.msrb.gmra.mxu0 %v494_v26  ;;  %836 = vmatmul.f32.vlgmr.msra.gmra.mxu1 %v490_v18 }
 0x153   :  { %809 = vmatpush.msra.mxu0 %v716_v14 }
 0x15a   :  { %811 = vmatmul.f32.vlgmr.msra.gmra.mxu0 %v490_v18 }
 0x1b7   :  { %v537_v27 = vpop.f32.mrf.mxu1 }
 0x1bd   :  { %v627_v36 = vpop.f32.mrf.mxu2 }
 0x1be   :  { %v652_v38 = vpop.f32.mrf.mxu3 }
 0x1bf   :  { %v496_v30 = vpop.f32.mrf.mxu0  ;;  %v594_v32 = vpop.f32.mrf.mxu1 }
 0x1c0   :  { %v497_v31 = vadd.f32 %v496_v30, %v462_v29 }
 0x1c2   :  { %v538_v33 = vadd.f32 %v537_v27, %v497_v31 }
 0x1c6   :  { %v752_v47 = vpop.f32.mrf.mxu2  ;;  %v779_v49 = vpop.f32.mrf.mxu3 }
 0x1c7   :  { %v567_v34 = vpop.f32.mrf.mxu0  ;;  %v722_v42 = vpop.f32.mrf.mxu1 }
 0x1c8   :  { %v568_v35 = vadd.f32 %v567_v34, %v538_v33 }
 0x1ca   :  { %v595_v37 = vadd.f32 %v594_v32, %v568_v35 }
 0x1cc   :  { %v628_v39 = vadd.f32 %v627_v36, %v595_v37 }
 0x1ce   :  { %v653_v41 = vadd.f32 %v652_v38, %v628_v39 }
 0x1cf   :  { %v681_v43 = vpop.f32.mrf.mxu0  ;;  %v837_v54 = vpop.f32.mrf.mxu1 }
 0x1d0   :  { %v840_v44 = vmul.f32 0.5, %v653_v41  ;;  %v682_v45 = vadd.f32 %v681_v43, %v463_v40 }
 0x1d2   :  { %870 = vtanh.f32 %v840_v44  ;;  %v723_v46 = vadd.f32 %v722_v42, %v682_v45 }
 0x1d4   :  { %v753_v48 = vadd.f32 %v752_v47, %v723_v46 }
 0x1d6   :  { %v780_v50 = vadd.f32 %v779_v49, %v753_v48 }
 0x1d7   :  { %v812_v51 = vpop.f32.mrf.mxu0 }
 0x1d8   :  { %v871_v52 = vpop.eup %870  ;;  %v813_v53 = vadd.f32 %v812_v51, %v780_v50 }
 0x1d9   :  { %v844_v55 = vmul.f32 0.5, %v871_v52 }
 0x1da   :  { %v838_v56 = vadd.f32 %v837_v54, %v813_v53 }
 0x1db   :  { %v846_v57 = vadd.f32 0.5, %v844_v55 }
 0x1dc   :  { %v841_v58 = vmul.f32 0.5, %v838_v56 }
 0x1dd   :  { %848 = vst [vmem:[#allocation2] sm:$0xff] %v846_v57 }
 0x1de   :  { %872 = vtanh.f32 %v841_v58 }
 0x1e4   :  { %v873_v59 = vpop.eup %872 }
 0x1e5   :  { %v845_v60 = vmul.f32 0.5, %v873_v59 }
 0x1e7   :  { %v847_v61 = vadd.f32 0.5, %v845_v60 }
 0x1e9   :  { %850 = vst.msk [vmem:[#allocation2 + $0x8] sm:$0xff] %vm849_vm3, %v847_v61 }
 0x1ea   :  { %861 = dma.vmem_to_hbm [thread:$0]  %s857_s14, 256, %s859_s17, [#allocation3]  }
 0x1eb   :  { %898 = dma.done.wait [#allocation3], 256  }
 0x1ec   :  { %899 = vsyncadd [#allocation3], 4294967040 }
 0x1ed   :  { %866 = vsyncpa [#allocation3], 1 }

</bundles_post_ra>
